<compile_context>
chip_gen: v5e
topology: v5e:2x2
jax: 0.10.0
libtpu: 0.0.40
codegen_flags: <defaults>
</compile_context>

<pallas_src>
import functools

import jax
import jax.numpy as jnp
from jax import lax
from jax.experimental import pallas as pl
from jax.experimental.pallas import tpu as pltpu

_LANE = 128


def _round_up(x, m):
    return (x + m - 1) // m * m


# ----------------------------------------------------------------------------
# Stateless per-element hash for the dropout mask (portable: int32 ops only).
# ----------------------------------------------------------------------------
def _lsr(x, k):
    # Logical right shift on int32 = arithmetic shift + mask of the top k bits.
    return (x >> k) & jnp.int32((1 << (32 - k)) - 1)


def _mix32(x):
    # murmur3 fmix32 finalizer (wrapping int32 arithmetic).
    x = x ^ _lsr(x, 16)
    x = x * jnp.int32(-2048144789)      # 0x85EBCA6B
    x = x ^ _lsr(x, 13)
    x = x * jnp.int32(-1028477387)      # 0xC2B2AE35
    x = x ^ _lsr(x, 16)
    return x


# ----------------------------------------------------------------------------
# Kernels
# ----------------------------------------------------------------------------
def _head_eval_kernel(x_ref, w_ref, b_ref, o_ref):
    # Eval-mode dropout is identity; just the affine classifier on the MXU.
    acc = jnp.dot(x_ref[...], w_ref[...], preferred_element_type=jnp.float32)
    o_ref[...] = (acc + b_ref[...]).astype(o_ref.dtype)


def _head_train_kernel(seed_ref, x_ref, w_ref, b_ref, o_ref, *,
                       tm, hidden, threshold24, inv_keep):
    # Inverted dropout (matches nn.Dropout): keep with prob (1 - rate), scale
    # by 1/(1 - rate).  The mask comes from a stateless counter hash of the
    # global element index mixed with the seed, so every tile / every seed
    # gets an independent stream (~10 int VPU ops per element; hides under
    # the x DMA on v5e/v6e — drop to a single _mix32 round if VPU-bound on v7x).
    x = x_ref[...]
    s = seed_ref[0]
    row = lax.broadcasted_iota(jnp.int32, x.shape, 0) + pl.program_id(0) * tm
    col = lax.broadcasted_iota(jnp.int32, x.shape, 1)
    idx = row * jnp.int32(hidden) + col            # wraps for huge M*H: fine for hashing
    h = _mix32(idx ^ (s * jnp.int32(0x27D4EB2F)))
    h = _mix32(h ^ s)
    bits24 = _lsr(h, 8)                            # uniform in [0, 2^24)
    keep = bits24 >= jnp.int32(threshold24)        # P(keep) = 1 - rate (24-bit exact)
    x = jnp.where(keep, x, jnp.zeros_like(x))

    acc = jnp.dot(x, w_ref[...], preferred_element_type=jnp.float32)
    acc = acc * jnp.float32(inv_keep)              # fold 1/(1-p) into the tiny accumulator
    o_ref[...] = (acc + b_ref[...]).astype(o_ref.dtype)


# ----------------------------------------------------------------------------
# Parameter prep (hoist out of the per-call path; do once and cache)
# ----------------------------------------------------------------------------
def prepare_classifier_params(weight, bias, param_dtype=None):
    """weight: [L, H] (nn.Linear convention), bias: [L].
       Returns lane-dense (H, LP) weight and (1, LP) f32 bias, LP = round_up(L, 128)."""
    L, H = weight.shape
    LP = _round_up(max(L, 1), _LANE)
    pdt = param_dtype if param_dtype is not None else weight.dtype
    w_t = jnp.zeros((H, LP), dtype=pdt).at[:, :L].set(weight.T.astype(pdt))
    b2d = jnp.zeros((1, LP), dtype=jnp.float32).at[:, :L].set(
        bias.astype(jnp.float32).reshape(1, L))
    return w_t, b2d


def _select_row_tile(M, H, x_bytes, LP, out_bytes, align):
    """Biggest row tile whose double-buffered working set fits a ~24 MiB budget
       (leaves headroom under the 32 MiB scoped-VMEM limit we request), capped
       at 2048 rows, and capped so the grid has >= 2 steps (v7x megacore)."""
    per_row = 2 * H * x_bytes + 2 * LP * out_bytes       # x + out, double-buffered
    budget = 24 * 1024 * 1024
    tm = max(align, (budget // per_row) // align * align)
    tm = min(tm, 2048)
    tm = min(tm, max(align, _round_up(pl.cdiv(M, 2), align)))
    return tm


# ----------------------------------------------------------------------------
# Forward
# ----------------------------------------------------------------------------
def _forward(inputs, w_t, b2d, num_labels, *, dropout_rate, train, seed):
    B, S, H = inputs.shape
    M = B * S
    LP = w_t.shape[1]
    x2d = inputs.reshape(M, H)
    if w_t.dtype != x2d.dtype:
        # Keep both MXU operands in the activation dtype (bf16 x -> bf16 w).
        w_t = w_t.astype(x2d.dtype)

    x_bytes = jnp.dtype(x2d.dtype).itemsize
    align = 16 if x_bytes == 2 else 8
    TM = _select_row_tile(M, H, x_bytes, LP, x_bytes, align)
    grid = (pl.cdiv(M, TM),)          # no host-side pad; ragged edge block is masked

    out_shape = jax.ShapeDtypeStruct((M, LP), x2d.dtype)
    cost = pl.CostEstimate(
        flops=2 * M * H * LP,
        transcendentals=0,
        bytes_accessed=(M * H * x_bytes + M * LP * x_bytes
                        + H * LP * jnp.dtype(w_t.dtype).itemsize + LP * 4))
    cparams = pltpu.CompilerParams(
        dimension_semantics=("parallel",),
        vmem_limit_bytes=32 * 1024 * 1024)

    if (not train) or dropout_rate == 0.0:
        out = pl.pallas_call(
            _head_eval_kernel,
            out_shape=out_shape,
            grid=grid,
            in_specs=[
                pl.BlockSpec((TM, H), lambda i: (i, 0)),   # streamed row tiles
                pl.BlockSpec((H, LP), lambda i: (0, 0)),   # weight stays resident
                pl.BlockSpec((1, LP), lambda i: (0, 0)),   # bias stays resident
            ],
            out_specs=pl.BlockSpec((TM, LP), lambda i: (i, 0)),
            compiler_params=cparams,
            cost_estimate=cost,
        )(x2d, w_t, b2d)
    else:
        rate = float(dropout_rate)
        threshold24 = min(int(round(rate * (1 << 24))), (1 << 24) - 1)
        kern = functools.partial(_head_train_kernel,
                                 tm=TM, hidden=H,
                                 threshold24=threshold24,
                                 inv_keep=1.0 / (1.0 - rate))
        out = pl.pallas_call(
            kern,
            out_shape=out_shape,
            grid_spec=pltpu.PrefetchScalarGridSpec(
                num_scalar_prefetch=1,
                grid=grid,
                in_specs=[
                    pl.BlockSpec((TM, H), lambda i, seed_ref: (i, 0)),
                    pl.BlockSpec((H, LP), lambda i, seed_ref: (0, 0)),
                    pl.BlockSpec((1, LP), lambda i, seed_ref: (0, 0)),
                ],
                out_specs=pl.BlockSpec((TM, LP), lambda i, seed_ref: (i, 0)),
            ),
            compiler_params=cparams,
            cost_estimate=cost,
        )(jnp.asarray([seed], dtype=jnp.int32), x2d, w_t, b2d)

    # Lane-only slice (rows were never padded), then back to [B, S, L].
    return out[:, :num_labels].reshape(B, S, num_labels)


def make_token_classification_head(weight, bias, *, dropout_rate=0.1,
                                   param_dtype=None):
    """Prepares (transposes / lane-pads) the classifier params once and returns
       a forward callable — the recommended entry point."""
    num_labels = weight.shape[0]
    w_t, b2d = prepare_classifier_params(weight, bias, param_dtype)

    def forward(inputs, *, train=False, seed=0):
        return _forward(inputs, w_t, b2d, num_labels,
                        dropout_rate=dropout_rate, train=train, seed=seed)

    return forward


def token_classification_head(inputs, weight, bias, *, dropout_rate=0.1,
                              train=False, seed=0):
    """Convenience one-shot wrapper (re-prepares params every call)."""
    w_t, b2d = prepare_classifier_params(weight, bias)
    return _forward(inputs, w_t, b2d, weight.shape[0],
                    dropout_rate=dropout_rate, train=train, seed=seed)


# ----------------------------------------------------------------------------
# Demo
# ----------------------------------------------------------------------------
if __name__ == "__main__":
    # Small config consistent with the module: hidden_size=32, num_labels=5.
    B, S, H, L = 2, 8, 32, 5
    key = jax.random.PRNGKey(0)
    k_x, k_w, k_b = jax.random.split(key, 3)

    inputs = jax.random.normal(k_x, (B, S, H), dtype=jnp.float32)
    # nn.Linear parameter shapes: (L, H) weight, (L,) bias.
    weight = jax.random.normal(k_w, (L, H), dtype=jnp.float32) * 0.02
    bias = jax.random.normal(k_b, (L,), dtype=jnp.float32) * 0.02

    ref = inputs @ weight.T + bias

    # Param prep hoisted (done once here, reused for every forward call).
    head = make_token_classification_head(weight, bias, dropout_rate=0.1)

    # Eval mode (dropout = identity), matching module.eval() semantics.
    out = jax.block_until_ready(head(inputs, train=False))
    assert out.shape == (B, S, L)
    assert jnp.allclose(out, ref, atol=2e-3, rtol=2e-3), "eval mismatch vs reference"

    # Train kernel with a negligible dropout rate must reproduce the eval
    # result (exercises the hash/mask/scale path deterministically).
    head_p0 = make_token_classification_head(weight, bias, dropout_rate=1e-9)
    out_p0 = jax.block_until_ready(head_p0(inputs, train=True, seed=7))
    assert jnp.allclose(out_p0, ref, atol=2e-3, rtol=2e-3), "train(p~0) mismatch"

    # Train mode with real dropout: stochastic mask; sanity-check shape/finiteness.
    out_tr = jax.block_until_ready(head(inputs, train=True, seed=42))
    assert out_tr.shape == (B, S, L)
    assert bool(jnp.isfinite(out_tr).all())

    print("KERNEL_OK")
</pallas_src>

<mosaic_0001>
module attributes {stable_mosaic.version = 11 : i64} {
  func.func @_head_eval_kernel(%arg0: i32, %arg1: memref<8x32xf32, #tpu.memory_space<vmem>>, %arg2: memref<32x128xf32, #tpu.memory_space<vmem>>, %arg3: memref<1x128xf32, #tpu.memory_space<vmem>>, %arg4: memref<8x128xf32, #tpu.memory_space<vmem>>) attributes {dimension_semantics = [#tpu.dimension_semantics<parallel>], iteration_bounds = array<i64: 2>, scalar_prefetch = 0 : i64, scratch_operands = 0 : i64, tpu.core_type = #tpu.core_type<tc>, window_params = [{transform_indices = @transform_0, window_bounds = array<i64: 8, 32>}, {pipeline_mode = #tpu.pipeline_mode<synchronous>, transform_indices = @transform_1, window_bounds = array<i64: 32, 128>}, {pipeline_mode = #tpu.pipeline_mode<synchronous>, transform_indices = @transform_2, window_bounds = array<i64: 1, 128>}, {transform_indices = @transform_3, window_bounds = array<i64: 8, 128>}]} {
    %c0 = arith.constant 0 : index
    %c0_0 = arith.constant 0 : index
    %0 = vector.load %arg1[%c0, %c0_0] : memref<8x32xf32, #tpu.memory_space<vmem>>, vector<8x32xf32>
    %c0_1 = arith.constant 0 : index
    %c0_2 = arith.constant 0 : index
    %1 = vector.load %arg2[%c0_1, %c0_2] : memref<32x128xf32, #tpu.memory_space<vmem>>, vector<32x128xf32>
    %cst = arith.constant dense<0.000000e+00> : vector<8x128xf32>
    %2 = tpu.matmul %0, %1, %cst {dimension_numbers = #tpu.dot_dimension_numbers<[1], [0], [0], [1], [0, 0, 1, 1], [], []>} : vector<8x32xf32>, vector<32x128xf32>, vector<8x128xf32> -> vector<8x128xf32>
    %c0_3 = arith.constant 0 : index
    %c0_4 = arith.constant 0 : index
    %3 = vector.load %arg3[%c0_3, %c0_4] : memref<1x128xf32, #tpu.memory_space<vmem>>, vector<1x128xf32>
    %4 = vector.broadcast %3 : vector<1x128xf32> to vector<8x128xf32>
    %5 = arith.addf %2, %4 : vector<8x128xf32>
    %c0_5 = arith.constant 0 : index
    %c0_6 = arith.constant 0 : index
    %6 = vector.load %arg4[%c0_5, %c0_6] : memref<8x128xf32, #tpu.memory_space<vmem>>, vector<8x128xf32>
    tpu.vector_store %arg4[%c0_5, %c0_6], %5 {strides = array<i32>} : memref<8x128xf32, #tpu.memory_space<vmem>>, vector<8x128xf32>,
    return
  }
  func.func @transform_0(%arg0: i32) -> (i32, i32) {
    %c0_i32 = arith.constant 0 : i32
    %c0_i32_0 = arith.constant 0 : i32
    return %arg0, %c0_i32 : i32, i32
  }
  func.func @transform_1(%arg0: i32) -> (i32, i32) {
    %c0_i32 = arith.constant 0 : i32
    %c0_i32_0 = arith.constant 0 : i32
    %c0_i32_1 = arith.constant 0 : i32
    return %c0_i32, %c0_i32_0 : i32, i32
  }
  func.func @transform_2(%arg0: i32) -> (i32, i32) {
    %c0_i32 = arith.constant 0 : i32
    %c0_i32_0 = arith.constant 0 : i32
    %c0_i32_1 = arith.constant 0 : i32
    return %c0_i32, %c0_i32_0 : i32, i32
  }
  func.func @transform_3(%arg0: i32) -> (i32, i32) {
    %c0_i32 = arith.constant 0 : i32
    %c0_i32_0 = arith.constant 0 : i32
    return %arg0, %c0_i32 : i32, i32
  }
}

</mosaic_0001>

<bundles_post_ra>
// kernel: tpu_custom_call.1
= control target key start
LH: loop header
LB: loop body
LE: loop exit
PB: predicated region body
PF: predicated region fallthrough
CT: control target
= control target key end

     0   :  { %8 = vsyncpa [#allocation3], 0  ;;  %s704_s0 = inlined_call_operand.hbm [shape: f32[16,32], index: 0, kind: input, shape index: {}]   ;;  %s705_s1 = inlined_call_operand.hbm [shape: f32[32,128], index: 1, kind: input, shape index: {}]   ;;  %s706_s2 = inlined_call_operand.vmem [shape: f32[1,128], index: 2, kind: input, shape index: {}]   ;;  %s707_s3 = inlined_call_operand.hbm [shape: f32[16,128], index: 3, kind: output, shape index: {}]  }
   0x1   :  { %10 = vsyncpa [#allocation3 + $0x1], 0 }
   0x2   :  { %11 = vsyncpa [#allocation6], 0 }
   0x3   :  { %12 = vsyncpa [#allocation4], 0 }
   0x4   :  { %14 = vsyncpa [#allocation4 + $0x1], 0  ;;  %s565_s12 = smov 0   ;;  %s567_s13 = smov 0  }
   0x5   :  { %s569_s14 = smov 0   ;;  %s571_s15 = smov 0  }
   0x6 LB: > { %s130_s18 = sshll.u32 %s705_s1, 4  ;;  %s589_s19 = sadd.s32 4294967295, %s540_s15   ;;  %s540_s15 = sphi %s571_s15, %s717_s15   ;;  %s536_s14 = sphi %s569_s14, %s716_s14   ;;  %s532_s13 = sphi %s567_s13, %s715_s13   ;;  %s528_s12 = sphi %s565_s12, %s714_s12   ;;  %s131_s18 = int_to_ptr.hbm [resolvable:$true] %s130_s18 }
   0x7   : > { %p336_p0 = scmp.ge.s32.totalorder %s540_s15, 1  ;;  %p41_p1 = scmp.eq.s32.totalorder %s589_s19, 0 }
   0x8   : > { %p119_p2 = scmp.lt.s32.totalorder %s540_s15, 3  ;;  %s542_s21 = smov [#allocation5]  }
   0x9   : > { %s132_s22 = sshll.u32 %s542_s21, 4  ;;  %s543_s23 = smov 128   ;;  %s133_s22 = int_to_ptr.vmem [resolvable:$true] %s132_s22 }
   0xa   : > { %p594_p3 = pnand %p336_p0, %p119_p2  ;;  %s544_s24 = smov 8  }
   0xb   : > { %s335_s25 = sadd.s32 4294967294, %s540_s15   ;;  %s605_s26 = sadd.s32 1, %s540_s15  }
   0xc   : > { %p358_p4 = pneg %p594_p3  ;;  %s27_s27 = sadd.s32 1, %s536_s14 }
   0xd   : > { %s24_s28 = ssub.s32 %s540_s15, %s605_s26  ;;  %p34_p7 = scmp.ne.s32.totalorder %s536_s14, %s532_s13 }
   0xe   : > { %p359_p6 = pnand %p358_p4, %p41_p1  ;;  %p25_p8 = scmp.eq.s32.totalorder %s24_s28, 0 }
   0xf   : > { %p35_p9 = scmp.eq.s32.totalorder %s540_s15, 0  ;;  %p40_p10 = scmp.ne.s32.totalorder %s532_s13, %s528_s12 }
  0x10   : > { %361 = dma.hbm_to_vmem [thread:$0]  (!%p359_p6), %s131_s18, 512, %s133_s22, [#allocation6], %s543_s23, %s543_s23, %s544_s24  }
  0x11   : > { %p106_p11 = scmp.eq.s32.totalorder %s589_s19, 1  ;;  %p621_p12 = por %p41_p1, %p40_p10 }
  0x12   : > { %s617_s29 = scalar_select %p25_p8, %s536_s14, %s27_s27  }
  0x13   : > { %p625_p13 = por %p106_p11, %p34_p7  ;;  %p112_p0 = scmp.eq.s32.totalorder %s335_s25, 1 }
  0x14   : > { %p36_p2 = por %p35_p9, %p34_p7  ;;  %s149_s5 = sand.u32 1, %s536_s14  }
  0x15   : > { %p630_p4 = por %p112_p0, %p40_p10  ;;  %p371_p6 = scmp.lt.s32.totalorder %s540_s15, 2 }
  0x16   : > { %s339_s7 = sshll.u32 %s149_s5, 3  ;;  %s340_s8 = sshll.u32 %s540_s15, 3 }
  0x17   : > { %s157_s11 = scalar_lea.hbm %s704_s0, %s340_s8  ;;  %s153_s17 = scalar_lea.vmem [#allocation2], %s339_s7 }
  0x18   : > { %s159_s16 = sshll.u32 %s157_s11, 4  ;;  %s161_s18 = sshll.u32 %s153_s17, 4  ;;  %s160_s16 = int_to_ptr.hbm [resolvable:$true] %s159_s16  ;;  %s162_s18 = int_to_ptr.vmem [resolvable:$true] %s161_s18 }
  0x19   : > { %p639_p8 = pnand %p371_p6, %p36_p2  ;;  %s150_s22 = scalar_lea.sflag [#allocation3], %s149_s5 }
  0x1a   : > { %s440_s23 = sshra.s32 %s160_s16, 4  ;;  %s447_s28 = scalar_lea.hbm %s704_s0, 16  ;;  %s441_s23 = int_to_ptr.hbm [resolvable:$true] %s440_s23 }
  0x1b   : > { %s442_s24 = scalar_lea.hbm %s441_s23, 8  ;;  %p444_p9 = pneg %p639_p8 }
  0x1c   : > { %p443_p7 = scmp.ne.s32.totalorder %s441_s23, %s442_s24  ;;  %p448_p0 = scmp.lt.s32.totalorder %s441_s23, %s704_s0 }
  0x1d   : > { %p449_p2 = scmp.lt.s32.totalorder %s447_s28, %s442_s24 }
  0x1e   : > { %p445_p10 = pnand %p444_p9, %p443_p7 }
  0x1f   : > { %p450_p6 = por %p449_p2, %p448_p0 }
  0x20   : > { %p446_p11 = pneg %p445_p10 }
  0x22   : > { %p451_p5 = pnand %p450_p6, %p446_p11 }
  0x24   : > { %454 = shalt.err (!%p451_p5)
}
  0x25   : > { %365 = dma.hbm_to_vmem [thread:$0]  (!%p639_p8), %s160_s16, 128, %s162_s18, %s150_s22  }
  0x26   : > { %170 = sbr.rel (%p594_p3) target bundleno = 185 (0xb9), region = 32  ;;  %s656_s5 = sand.u32 (!%p594_p3), 1, %s532_s13  }
  0x27   : > { %s342_s9 = sshll.u32 (!%p594_p3), %s656_s5, 3  ;;  %s173_s10 = scalar_lea.sflag (!%p594_p3), [#allocation3], %s656_s5 }
  0x28   : > { %s176_s11 = scalar_lea.vmem (!%p594_p3), [#allocation2], %s342_s9 }
  0x2b   : > { %515 = dma.done.wait (%p621_p12), %s173_s10, 128  }
  0x2c   : > { %517 = vsyncadd (%p621_p12), %s173_s10, 4294967168 }
  0x2d   : > { %519 = dma.done.wait (%p41_p1), [#allocation6], 512  }
  0x2e   : > { %521 = vsyncadd (%p41_p1), [#allocation6], 4294966784  ;;  %v209_v0 = vld [vmem:[#allocation5 + $0x18] sm:$0xff]  ;;  %v208_v1 = vld [vmem:[#allocation5 + $0x10] sm:$0xff]  ;;  %vm214_vm0 = vcmask 261120   ;;  %s347_s20 = sshll.u32 %s589_s19, 3 }
  0x2f   : > { %230 = vmatpush.msra.mxu0 %v209_v0  ;;  %v207_v2 = vld [vmem:[#allocation5 + $0x8] sm:$0xff]  ;;  %v206_v3 = vld [vmem:[#allocation5] sm:$0xff]  ;;  %v205_v4 = vld [vmem:[%s176_s11] sm:$0xff]  ;;  %s250_s17 = scalar_lea.hbm %s707_s3, %s347_s20  ;;  %s204_s22 = scalar_lea.vmem [#allocation7], %s342_s9 }
  0x30   : > { %v409_v5 = vld [vmem:[%s706_s2] ss:$0 sm:$0xff]  ;;  %s252_s23 = sshll.u32 %s204_s22, 4  ;;  %s254_s24 = sshll.u32 %s250_s17, 4  ;;  %s253_s23 = int_to_ptr.vmem [resolvable:$true] %s252_s23  ;;  %s255_s24 = int_to_ptr.hbm [resolvable:$true] %s254_s24 }
  0x31   : > { %231 = vmatpush.msra.mxu0 %v208_v1  ;;  %s240_s25 = scalar_lea.sflag [#allocation4], %s656_s5  ;;  %s484_s27 = sshra.s32 %s255_s24, 4  ;;  %s485_s27 = int_to_ptr.hbm [resolvable:$true] %s484_s27 }
  0x32   : > { %s486_s19 = scalar_lea.hbm %s485_s27, 8  ;;  %s490_s8 = scalar_lea.hbm %s707_s3, 16 }
  0x33   : > { %232 = vmatpush.msra.mxu0 %v207_v2  ;;  %p487_p1 = scmp.ne.s32.totalorder %s485_s27, %s486_s19  ;;  %p491_p12 = scmp.lt.s32.totalorder %s485_s27, %s707_s3 }
  0x34   : > { %p492_p8 = scmp.lt.s32.totalorder %s490_s8, %s486_s19 }
  0x35   : > { %233 = vmatpush.msra.mxu0 %v206_v3  ;;  %p488_p3 = pnand %p487_p1, %p625_p13 }
  0x36   : > { %345 = vmatmul.msk.f32.vlgmr.msra.gmra.mxu0 %vm214_vm0, %v205_v4  ;;  %p493_p7 = por %p492_p8, %p491_p12 }
  0x37   : > { %p489_p5 = pneg %p488_p3 }
  0x39   : > { %p494_p9 = pnand %p493_p7, %p489_p5 }
  0xb3   : > { %v235_v6 = vpop.f32.mrf.mxu0 }
  0xb4   : > { %v236_v7 = vadd.f32 %v409_v5, %v235_v6 }
  0xb6   : > { %238 = vst [vmem:[%s204_s22] sm:$0xff] %v236_v7 }
  0xb7   : > { %497 = shalt.err (!%p494_p9)
}
  0xb8   : > { %356 = dma.vmem_to_hbm [thread:$0]  (%p625_p13), %s253_s23, 128, %s255_s24, %s240_s25  }
  0xb9 PF: > { %s266_s5 = sand.u32 1, %s528_s12   ;;  %p713_p10 = scmp.ge.s32.totalorder %s540_s15, 2 }
  0xba   : > { %s267_s11 = scalar_lea.sflag [#allocation4], %s266_s5 }
  0xbb   : > { %p367_p11 = pnand %p713_p10, %p630_p4 }
  0xbd   : > { %p368_p0 = pneg %p367_p11 }
  0xbf   : > { %523 = dma.done.wait (%p368_p0), %s267_s11, 128  }
  0xc0   : > { %525 = vsyncadd (%p368_p0), %s267_s11, 4294967168  ;;  %p17_p2 = scmp.ge.s32.totalorder %s605_s26, 4   ;;  %s714_s12 = smov %s532_s13 }
  0xc1   : > { %s715_s13 = smov %s536_s14  ;;  %s716_s14 = smov %s617_s29 }
  0xc2   : > { %s717_s15 = smov %s605_s26  ;;  %19 = sbr.rel (!%p17_p2) target bundleno = 6 (0x6), region = 81 }
  0xc7   :  { %273 = vsyncpa [#allocation3], 1 }
  0xc8   :  { %275 = vsyncpa [#allocation3 + $0x1], 1 }
  0xc9   :  { %276 = vsyncpa [#allocation6], 1 }
  0xca   :  { %277 = vsyncpa [#allocation4], 1 }
  0xcb   :  { %279 = vsyncpa [#allocation4 + $0x1], 1 }

</bundles_post_ra>
